<compile_context>
chip_gen: v7x
topology: tpu7x:2x2x1
jax: 0.10.0
libtpu: 0.0.40
codegen_flags: <defaults>
</compile_context>

<pallas_src>
import math

import jax
import jax.numpy as jnp
from jax import lax
from jax.experimental import pallas as pl
from jax.experimental.pallas import tpu as pltpu

LN_EPS = 1e-5
LANE = 128          # lane width: feature axes padded to this
SUBLANE = 8         # sublane granularity for the row tile
ROW_TILE_CAP = 256  # max rows per grid step (fits VMEM on v5e/v6e/v7x easily)


def _round_up(n, m):
    return ((n + m - 1) // m) * m


def _exact_gelu(y):
    # PyTorch nn.GELU default = exact erf formulation.
    return 0.5 * y * (1.0 + lax.erf(y * (1.0 / math.sqrt(2.0))))


def _make_fused_mlp_kernel(n_layers, real_out_dims):
    """Kernel computing the full MLP on one resident row tile.

    real_out_dims[i] is the UNPADDED output width of layer i; the LayerNorm
    statistics divide by it so the zero-padded lanes do not bias mean/var.
    """

    def kernel(x_ref, *refs):
        o_ref = refs[-1]
        p_refs = refs[:-1]

        y = x_ref[...].astype(jnp.float32)
        idx = 0
        for i in range(n_layers):
            w = p_refs[idx][...]
            b = p_refs[idx + 1][...]
            idx += 2
            y = jnp.dot(y, w, preferred_element_type=jnp.float32) + b
            if i < n_layers - 1:
                g = p_refs[idx][...]
                beta = p_refs[idx + 1][...]
                idx += 2
                y = _exact_gelu(y)
                # Masked-count LayerNorm: padded lanes of y are exactly 0,
                # so plain sums over the padded width are sums over the real
                # features; divide by the real width.
                inv_d = 1.0 / float(real_out_dims[i])
                mean = jnp.sum(y, axis=-1, keepdims=True) * inv_d
                ex2 = jnp.sum(y * y, axis=-1, keepdims=True) * inv_d
                var = ex2 - mean * mean
                y = (y - mean) * lax.rsqrt(var + LN_EPS)
                y = y * g + beta            # padded lanes -> 0 (g, beta padded with 0)
        o_ref[...] = y.astype(o_ref.dtype)

    return kernel


@jax.jit
def mlp_forward(x, params):
    """x: [B, sizes[0]] float32; params: list of per-layer dicts (see init)."""
    B, d_in = x.shape
    n_layers = len(params)
    dims = [d_in] + [layer["w"].shape[1] for layer in params]
    pdims = [_round_up(d, LANE) for d in dims]           # lane-dense feature widths

    tm = min(ROW_TILE_CAP, _round_up(B, SUBLANE))        # large row tile, multiple of 8
    b_pad = _round_up(B, tm)

    x_p = jnp.pad(x, ((0, b_pad - B), (0, pdims[0] - d_in)))

    flat_params = []
    for i, layer in enumerate(params):
        di, do = layer["w"].shape
        w = jnp.pad(layer["w"], ((0, pdims[i] - di), (0, pdims[i + 1] - do)))
        b = jnp.pad(layer["b"].reshape(1, -1), ((0, 0), (0, pdims[i + 1] - do)))
        flat_params += [w, b]
        if i < n_layers - 1:
            g = jnp.pad(layer["ln_w"].reshape(1, -1), ((0, 0), (0, pdims[i + 1] - do)))
            beta = jnp.pad(layer["ln_b"].reshape(1, -1), ((0, 0), (0, pdims[i + 1] - do)))
            flat_params += [g, beta]

    kernel = _make_fused_mlp_kernel(n_layers, dims[1:])

    # Broadcast (full-array) specs for all parameters; bind ndim via default
    # arg to avoid the shared-closure pitfall.
    param_specs = [
        pl.BlockSpec(p.shape, lambda i, nd=p.ndim: (0,) * nd) for p in flat_params
    ]

    out_p = pl.pallas_call(
        kernel,
        out_shape=jax.ShapeDtypeStruct((b_pad, pdims[-1]), x.dtype),
        grid=(b_pad // tm,),
        in_specs=[pl.BlockSpec((tm, pdims[0]), lambda i: (i, 0))] + param_specs,
        out_specs=pl.BlockSpec((tm, pdims[-1]), lambda i: (i, 0)),
        compiler_params=pltpu.CompilerParams(
            dimension_semantics=("parallel",),
        ),
    )(x_p, *flat_params)

    return out_p[:B, : dims[-1]]


def init_mlp_params(key, sizes, dtype=jnp.float32):
    """Shapes match nn.Linear / nn.LayerNorm; W stored transposed (in, out)."""
    params = []
    n_layers = len(sizes) - 1
    for i in range(n_layers):
        d_in, d_out = sizes[i], sizes[i + 1]
        key, kw, kb = jax.random.split(key, 3)
        bound = 1.0 / math.sqrt(d_in)  # PyTorch Linear default init
        w = jax.random.uniform(kw, (d_in, d_out), dtype, -bound, bound)
        b = jax.random.uniform(kb, (d_out,), dtype, -bound, bound)
        layer = {"w": w, "b": b}
        if i < n_layers - 1:
            layer["ln_w"] = jnp.ones((d_out,), dtype)   # LayerNorm default affine
            layer["ln_b"] = jnp.zeros((d_out,), dtype)
        params.append(layer)
    return params


def mlp_reference(x, params):
    """Pure-JAX reference for correctness checking."""
    n_layers = len(params)
    for i, layer in enumerate(params):
        y = x @ layer["w"] + layer["b"]
        if i < n_layers - 1:
            y = _exact_gelu(y)
            mean = jnp.mean(y, axis=-1, keepdims=True)
            var = jnp.mean((y - mean) ** 2, axis=-1, keepdims=True)
            y = (y - mean) * lax.rsqrt(var + LN_EPS)
            y = y * layer["ln_w"] + layer["ln_b"]
        x = y
    return x


if __name__ == "__main__":
    key = jax.random.PRNGKey(0)
    kx, kp = jax.random.split(key)

    # MLP(sizes): Linear(32,64) -> GELU -> LayerNorm(64) -> Linear(64,16)
    sizes = (32, 64, 16)
    batch = 16
    x = jax.random.normal(kx, (batch, sizes[0]), jnp.float32)
    params = init_mlp_params(kp, sizes)

    out = mlp_forward(x, params)
    out = jax.block_until_ready(out)

    ref = mlp_reference(x, params)
    assert out.shape == (batch, sizes[-1])
    assert jnp.allclose(out, ref, atol=1e-4, rtol=1e-4)

    print("KERNEL_OK")
</pallas_src>

<mosaic_0001>
module attributes {stable_mosaic.version = 11 : i64} {
  func.func @kernel(%arg0: i32, %arg1: memref<16x128xf32, #tpu.memory_space<vmem>>, %arg2: memref<128x128xf32, #tpu.memory_space<vmem>>, %arg3: memref<1x128xf32, #tpu.memory_space<vmem>>, %arg4: memref<1x128xf32, #tpu.memory_space<vmem>>, %arg5: memref<1x128xf32, #tpu.memory_space<vmem>>, %arg6: memref<128x128xf32, #tpu.memory_space<vmem>>, %arg7: memref<1x128xf32, #tpu.memory_space<vmem>>, %arg8: memref<16x128xf32, #tpu.memory_space<vmem>>) attributes {dimension_semantics = [#tpu.dimension_semantics<parallel>], iteration_bounds = array<i64: 1>, scalar_prefetch = 0 : i64, scratch_operands = 0 : i64, tpu.core_type = #tpu.core_type<tc>, window_params = [{transform_indices = @transform_0, window_bounds = array<i64: 16, 128>}, {pipeline_mode = #tpu.pipeline_mode<synchronous>, transform_indices = @transform_1, window_bounds = array<i64: 128, 128>}, {pipeline_mode = #tpu.pipeline_mode<synchronous>, transform_indices = @transform_2, window_bounds = array<i64: 1, 128>}, {pipeline_mode = #tpu.pipeline_mode<synchronous>, transform_indices = @transform_3, window_bounds = array<i64: 1, 128>}, {pipeline_mode = #tpu.pipeline_mode<synchronous>, transform_indices = @transform_4, window_bounds = array<i64: 1, 128>}, {pipeline_mode = #tpu.pipeline_mode<synchronous>, transform_indices = @transform_5, window_bounds = array<i64: 128, 128>}, {pipeline_mode = #tpu.pipeline_mode<synchronous>, transform_indices = @transform_6, window_bounds = array<i64: 1, 128>}, {transform_indices = @transform_7, window_bounds = array<i64: 16, 128>}]} {
    %c0 = arith.constant 0 : index
    %c0_0 = arith.constant 0 : index
    %0 = vector.load %arg1[%c0, %c0_0] : memref<16x128xf32, #tpu.memory_space<vmem>>, vector<16x128xf32>
    %c0_1 = arith.constant 0 : index
    %c0_2 = arith.constant 0 : index
    %1 = vector.load %arg2[%c0_1, %c0_2] : memref<128x128xf32, #tpu.memory_space<vmem>>, vector<128x128xf32>
    %c0_3 = arith.constant 0 : index
    %c0_4 = arith.constant 0 : index
    %2 = vector.load %arg3[%c0_3, %c0_4] : memref<1x128xf32, #tpu.memory_space<vmem>>, vector<1x128xf32>
    %cst = arith.constant dense<0.000000e+00> : vector<16x128xf32>
    %3 = tpu.matmul %0, %1, %cst {dimension_numbers = #tpu.dot_dimension_numbers<[1], [0], [0], [1], [0, 0, 1, 1], [], []>} : vector<16x128xf32>, vector<128x128xf32>, vector<16x128xf32> -> vector<16x128xf32>
    %4 = vector.broadcast %2 : vector<1x128xf32> to vector<16x128xf32>
    %5 = arith.addf %3, %4 : vector<16x128xf32>
    %c0_5 = arith.constant 0 : index
    %c0_6 = arith.constant 0 : index
    %6 = vector.load %arg4[%c0_5, %c0_6] : memref<1x128xf32, #tpu.memory_space<vmem>>, vector<1x128xf32>
    %c0_7 = arith.constant 0 : index
    %c0_8 = arith.constant 0 : index
    %7 = vector.load %arg5[%c0_7, %c0_8] : memref<1x128xf32, #tpu.memory_space<vmem>>, vector<1x128xf32>
    %cst_9 = arith.constant 5.000000e-01 : f32
    %8 = vector.broadcast %cst_9 : f32 to vector<16x128xf32>
    %9 = arith.mulf %8, %5 : vector<16x128xf32>
    %cst_10 = arith.constant 0.707106769 : f32
    %10 = vector.broadcast %cst_10 : f32 to vector<16x128xf32>
    %11 = arith.mulf %5, %10 : vector<16x128xf32>
    %12 = math.erf %11 : vector<16x128xf32>
    %cst_11 = arith.constant 1.000000e+00 : f32
    %13 = vector.broadcast %cst_11 : f32 to vector<16x128xf32>
    %14 = arith.addf %13, %12 : vector<16x128xf32>
    %15 = arith.mulf %9, %14 : vector<16x128xf32>
    %cst_12 = arith.constant dense<0.000000e+00> : vector<16xf32>
    %16 = vector.multi_reduction <add>, %15, %cst_12 [1] : vector<16x128xf32> to vector<16xf32>
    %17 = vector.shape_cast %16 : vector<16xf32> to vector<16x1xf32>
    %cst_13 = arith.constant 1.562500e-02 : f32
    %18 = vector.broadcast %cst_13 : f32 to vector<16x1xf32>
    %19 = arith.mulf %17, %18 : vector<16x1xf32>
    %20 = arith.mulf %15, %15 : vector<16x128xf32>
    %cst_14 = arith.constant dense<0.000000e+00> : vector<16xf32>
    %21 = vector.multi_reduction <add>, %20, %cst_14 [1] : vector<16x128xf32> to vector<16xf32>
    %22 = vector.shape_cast %21 : vector<16xf32> to vector<16x1xf32>
    %cst_15 = arith.constant 1.562500e-02 : f32
    %23 = vector.broadcast %cst_15 : f32 to vector<16x1xf32>
    %24 = arith.mulf %22, %23 : vector<16x1xf32>
    %25 = arith.mulf %19, %19 : vector<16x1xf32>
    %26 = arith.subf %24, %25 : vector<16x1xf32>
    %27 = vector.broadcast %19 : vector<16x1xf32> to vector<16x128xf32>
    %28 = arith.subf %15, %27 : vector<16x128xf32>
    %cst_16 = arith.constant 9.99999974E-6 : f32
    %29 = vector.broadcast %cst_16 : f32 to vector<16x1xf32>
    %30 = arith.addf %26, %29 : vector<16x1xf32>
    %31 = math.rsqrt %30 : vector<16x1xf32>
    %32 = vector.broadcast %31 : vector<16x1xf32> to vector<16x128xf32>
    %33 = arith.mulf %28, %32 : vector<16x128xf32>
    %34 = vector.broadcast %6 : vector<1x128xf32> to vector<16x128xf32>
    %35 = arith.mulf %33, %34 : vector<16x128xf32>
    %36 = vector.broadcast %7 : vector<1x128xf32> to vector<16x128xf32>
    %37 = arith.addf %35, %36 : vector<16x128xf32>
    %c0_17 = arith.constant 0 : index
    %c0_18 = arith.constant 0 : index
    %38 = vector.load %arg6[%c0_17, %c0_18] : memref<128x128xf32, #tpu.memory_space<vmem>>, vector<128x128xf32>
    %c0_19 = arith.constant 0 : index
    %c0_20 = arith.constant 0 : index
    %39 = vector.load %arg7[%c0_19, %c0_20] : memref<1x128xf32, #tpu.memory_space<vmem>>, vector<1x128xf32>
    %cst_21 = arith.constant dense<0.000000e+00> : vector<16x128xf32>
    %40 = tpu.matmul %37, %38, %cst_21 {dimension_numbers = #tpu.dot_dimension_numbers<[1], [0], [0], [1], [0, 0, 1, 1], [], []>} : vector<16x128xf32>, vector<128x128xf32>, vector<16x128xf32> -> vector<16x128xf32>
    %41 = vector.broadcast %39 : vector<1x128xf32> to vector<16x128xf32>
    %42 = arith.addf %40, %41 : vector<16x128xf32>
    %c0_22 = arith.constant 0 : index
    %c0_23 = arith.constant 0 : index
    %43 = vector.load %arg8[%c0_22, %c0_23] : memref<16x128xf32, #tpu.memory_space<vmem>>, vector<16x128xf32>
    tpu.vector_store %arg8[%c0_22, %c0_23], %42 {strides = array<i32>} : memref<16x128xf32, #tpu.memory_space<vmem>>, vector<16x128xf32>,
    return
  }
  func.func @transform_0(%arg0: i32) -> (i32, i32) {
    %c0_i32 = arith.constant 0 : i32
    %c0_i32_0 = arith.constant 0 : i32
    return %arg0, %c0_i32 : i32, i32
  }
  func.func @transform_1(%arg0: i32) -> (i32, i32) {
    %c0_i32 = arith.constant 0 : i32
    %c0_i32_0 = arith.constant 0 : i32
    %c0_i32_1 = arith.constant 0 : i32
    return %c0_i32, %c0_i32_0 : i32, i32
  }
  func.func @transform_2(%arg0: i32) -> (i32, i32) {
    %c0_i32 = arith.constant 0 : i32
    %c0_i32_0 = arith.constant 0 : i32
    %c0_i32_1 = arith.constant 0 : i32
    return %c0_i32, %c0_i32_0 : i32, i32
  }
  func.func @transform_3(%arg0: i32) -> (i32, i32) {
    %c0_i32 = arith.constant 0 : i32
    %c0_i32_0 = arith.constant 0 : i32
    %c0_i32_1 = arith.constant 0 : i32
    return %c0_i32, %c0_i32_0 : i32, i32
  }
  func.func @transform_4(%arg0: i32) -> (i32, i32) {
    %c0_i32 = arith.constant 0 : i32
    %c0_i32_0 = arith.constant 0 : i32
    %c0_i32_1 = arith.constant 0 : i32
    return %c0_i32, %c0_i32_0 : i32, i32
  }
  func.func @transform_5(%arg0: i32) -> (i32, i32) {
    %c0_i32 = arith.constant 0 : i32
    %c0_i32_0 = arith.constant 0 : i32
    %c0_i32_1 = arith.constant 0 : i32
    return %c0_i32, %c0_i32_0 : i32, i32
  }
  func.func @transform_6(%arg0: i32) -> (i32, i32) {
    %c0_i32 = arith.constant 0 : i32
    %c0_i32_0 = arith.constant 0 : i32
    %c0_i32_1 = arith.constant 0 : i32
    return %c0_i32, %c0_i32_0 : i32, i32
  }
  func.func @transform_7(%arg0: i32) -> (i32, i32) {
    %c0_i32 = arith.constant 0 : i32
    %c0_i32_0 = arith.constant 0 : i32
    return %arg0, %c0_i32 : i32, i32
  }
}

</mosaic_0001>

<bundles_post_ra>
// kernel: mlp_forward.1
= control target key start
LH: loop header
LB: loop body
LE: loop exit
PB: predicated region body
PF: predicated region fallthrough
CT: control target
= control target key end

     0   :  { %s687_s0 = inlined_call_operand.vmem [shape: f32[16,128], index: 0, kind: input, shape index: {}]   ;;  %s688_s1 = inlined_call_operand.vmem [shape: f32[128,128], index: 1, kind: input, shape index: {}]   ;;  %s689_s2 = inlined_call_operand.vmem [shape: f32[1,128], index: 2, kind: input, shape index: {}]   ;;  %s690_s3 = inlined_call_operand.vmem [shape: f32[1,128], index: 3, kind: input, shape index: {}]   ;;  %s691_s4 = inlined_call_operand.vmem [shape: f32[1,128], index: 4, kind: input, shape index: {}]   ;;  %s692_s5 = inlined_call_operand.vmem [shape: f32[128,128], index: 5, kind: input, shape index: {}]   ;;  %s693_s6 = inlined_call_operand.vmem [shape: f32[1,128], index: 6, kind: input, shape index: {}]   ;;  %s694_s7 = inlined_call_operand.hbm [shape: f32[16,128], index: 7, kind: output, shape index: {}]  }
   0x1   :  { %v29_v0 = vld [vmem:[%s688_s1] sm:$0xff]  ;;  %v30_v1 = vld [vmem:[%s688_s1 + $0x8] sm:$0xff]  ;;  %v31_v2 = vld [vmem:[%s688_s1 + $0x10] sm:$0xff] }
   0x2   :  { %v407_v3 = vpack.c.bf16 %v30_v1, %v29_v0  ;;  %v32_v4 = vld [vmem:[%s688_s1 + $0x18] sm:$0xff]  ;;  %v33_v6 = vld [vmem:[%s688_s1 + $0x20] sm:$0xff]  ;;  %v34_v7 = vld [vmem:[%s688_s1 + $0x28] sm:$0xff] }
   0x3   :  { %v411_v5 = vpack.c.bf16 %v32_v4, %v31_v2  ;;  %v415_v8 = vpack.c.bf16 %v34_v7, %v33_v6  ;;  %v27_v9 = vld [vmem:[%s687_s0] sm:$0xff]  ;;  %v35_v10 = vld [vmem:[%s688_s1 + $0x30] sm:$0xff]  ;;  %v36_v11 = vld [vmem:[%s688_s1 + $0x38] sm:$0xff] }
   0x4   :  { %408 = vmatprep.subr.bf16.mxu0 %v407_v3  ;;  %369 = vmatprep.mubr.f32.mxu0 %v27_v9 }
   0x5   :  { %410 = vmatpush3.bf16.msra.mxu0 %v407_v3 }
   0x6   :  { %412 = vmatprep.subr.bf16.mxu0 %v411_v5 }
   0x7   :  { %12 = vsyncpa [#allocation3], 0  ;;  %v419_v12 = vpack.c.bf16 %v36_v11, %v35_v10  ;;  %v37_v13 = vld [vmem:[%s688_s1 + $0x40] sm:$0xff]  ;;  %v38_v14 = vld [vmem:[%s688_s1 + $0x48] sm:$0xff] }
   0x8   :  { %v423_v15 = vpack.c.bf16 %v38_v14, %v37_v13  ;;  %v39_v16 = vld [vmem:[%s688_s1 + $0x50] sm:$0xff]  ;;  %v40_v17 = vld [vmem:[%s688_s1 + $0x58] sm:$0xff]  ;;  %v41_v19 = vld [vmem:[%s688_s1 + $0x60] sm:$0xff] }
   0x9   :  { %414 = vmatpush3.bf16.msra.mxu0 %v411_v5  ;;  %v427_v18 = vpack.c.bf16 %v40_v17, %v39_v16  ;;  %v42_v20 = vld [vmem:[%s688_s1 + $0x68] sm:$0xff]  ;;  %v43_v22 = vld [vmem:[%s688_s1 + $0x70] sm:$0xff]  ;;  %v44_v23 = vld [vmem:[%s688_s1 + $0x78] sm:$0xff] }
   0xa   :  { %416 = vmatprep.subr.bf16.mxu0 %v415_v8  ;;  %v431_v21 = vpack.c.bf16 %v42_v20, %v41_v19  ;;  %v435_v24 = vpack.c.bf16 %v44_v23, %v43_v22  ;;  %v28_v25 = vld [vmem:[%s687_s0 + $0x8] sm:$0xff]  ;;  %v181_v26 = vld [vmem:[%s692_s5] sm:$0xff]  ;;  %v183_v46 = vld [vmem:[%s692_s5 + $0x10] sm:$0xff] }
   0xb   :  { %v182_v27 = vld [vmem:[%s692_s5 + $0x8] sm:$0xff]  ;;  %v297_v29 = vld [vmem:[%s689_s2] ss:$0 sm:$0xff]  ;;  %v184_v47 = vld [vmem:[%s692_s5 + $0x18] sm:$0xff] }
   0xc   :  { %v439_v28 = vpack.c.bf16 %v182_v27, %v181_v26  ;;  %v443_v48 = vpack.c.bf16 %v184_v47, %v183_v46  ;;  %v185_v49 = vld [vmem:[%s692_s5 + $0x20] sm:$0xff]  ;;  %v186_v50 = vld [vmem:[%s692_s5 + $0x28] sm:$0xff]  ;;  %v187_v52 = vld [vmem:[%s692_s5 + $0x30] sm:$0xff] }
   0xd   :  { %418 = vmatpush3.bf16.msra.mxu0 %v415_v8  ;;  %v447_v51 = vpack.c.bf16 %v186_v50, %v185_v49  ;;  %v188_v53 = vld [vmem:[%s692_s5 + $0x38] sm:$0xff]  ;;  %v189_v55 = vld [vmem:[%s692_s5 + $0x40] sm:$0xff]  ;;  %v190_v56 = vld [vmem:[%s692_s5 + $0x48] sm:$0xff] }
   0xe   :  { %420 = vmatprep.subr.bf16.mxu0 %v419_v12  ;;  %440 = vmatprep.subr.bf16.mxu1 %v439_v28  ;;  %v451_v54 = vpack.c.bf16 %v188_v53, %v187_v52  ;;  %v455_v57 = vpack.c.bf16 %v190_v56, %v189_v55  ;;  %v191_v58 = vld [vmem:[%s692_s5 + $0x50] sm:$0xff]  ;;  %v192_v59 = vld [vmem:[%s692_s5 + $0x58] sm:$0xff]  ;;  %v193_v60 = vld [vmem:[%s692_s5 + $0x60] sm:$0xff] }
   0xf   :  { %442 = vmatpush3.bf16.msra.mxu1 %v439_v28  ;;  %v459_v61 = vpack.c.bf16 %v192_v59, %v191_v58  ;;  %v194_v62 = vld [vmem:[%s692_s5 + $0x68] sm:$0xff]  ;;  %v195_v0 = vld [vmem:[%s692_s5 + $0x70] sm:$0xff]  ;;  %v196_v1 = vld [vmem:[%s692_s5 + $0x78] sm:$0xff] }
  0x10   :  { %444 = vmatprep.subr.bf16.mxu1 %v443_v48  ;;  %v463_v63 = vpack.c.bf16 %v194_v62, %v193_v60  ;;  %v467_v2 = vpack.c.bf16 %v196_v1, %v195_v0  ;;  %v298_v19 = vld [vmem:[%s690_s3] ss:$0 sm:$0xff]  ;;  %s506_s3 = smov [#allocation2]  }
  0x11   :  { %422 = vmatpush3.bf16.msra.mxu0 %v419_v12  ;;  %s286_s24 = sshll.u32 %s506_s3, 4  ;;  %s287_s24 = int_to_ptr.vmem [resolvable:$true] %s286_s24 }
  0x12   :  { %424 = vmatprep.subr.bf16.mxu0 %v423_v15  ;;  %p487_p1 = scmp.lt.s32.totalorder %s287_s24, %s287_s24 }
  0x13   :  { %446 = vmatpush3.bf16.msra.mxu1 %v443_v48 }
  0x14   :  { %448 = vmatprep.subr.bf16.mxu1 %v447_v51 }
  0x15   :  { %426 = vmatpush3.bf16.msra.mxu0 %v423_v15 }
  0x16   :  { %428 = vmatprep.subr.bf16.mxu0 %v427_v18 }
  0x17   :  { %450 = vmatpush3.bf16.msra.mxu1 %v447_v51 }
  0x18   :  { %452 = vmatprep.subr.bf16.mxu1 %v451_v54 }
  0x19   :  { %430 = vmatpush3.bf16.msra.mxu0 %v427_v18 }
  0x1a   :  { %432 = vmatprep.subr.bf16.mxu0 %v431_v21 }
  0x1b   :  { %454 = vmatpush3.bf16.msra.mxu1 %v451_v54 }
  0x1c   :  { %456 = vmatprep.subr.bf16.mxu1 %v455_v57 }
  0x1d   :  { %434 = vmatpush3.bf16.msra.mxu0 %v431_v21  ;;  %v299_v21 = vld [vmem:[%s691_s4] ss:$0 sm:$0xff]  ;;  %s482_s4 = scalar_lea.vmem %s287_s24, 256 }
  0x1e   :  { %436 = vmatprep.subr.bf16.mxu0 %v435_v24  ;;  %p483_p0 = scmp.ne.s32.totalorder %s287_s24, %s482_s4  ;;  %p488_p2 = scmp.lt.s32.totalorder %s482_s4, %s482_s4 }
  0x1f   :  { %458 = vmatpush3.bf16.msra.mxu1 %v455_v57 }
  0x20   :  { %460 = vmatprep.subr.bf16.mxu1 %v459_v61  ;;  %p489_p3 = por %p488_p2, %p487_p1 }
  0x21   :  { %438 = vmatpush3.bf16.msra.mxu0 %v435_v24 }
  0x22   :  { %p490_p4 = pnand %p489_p3, %p483_p0 }
  0x23   :  { %462 = vmatpush3.bf16.msra.mxu1 %v459_v61 }
  0x24   :  { %370 = vmatmul.mubr.f32.vlgmr.msra.gmra.mrb[0].mxu0 %v28_v25  ;;  %464 = vmatprep.subr.bf16.mxu1 %v463_v63 }
  0x27   :  { %466 = vmatpush3.bf16.msra.mxu1 %v463_v63 }
  0x28   :  { %468 = vmatprep.subr.bf16.mxu1 %v467_v2 }
  0x2b   :  { %470 = vmatpush3.bf16.msra.mxu1 %v467_v2 }
  0xf7   :  { %v371_v30 = vpop.f32.mrb[0].mxu0 }
  0xf8   :  { %v124_v31 = vadd.f32 %v371_v30, %v297_v29  ;;  %v118_v32 = vpop.f32.mrb[1].mxu0 }
  0xf9   :  { %v119_v33 = vadd.f32 %v297_v29, %v118_v32  ;;  %v300_v29 = vld [vmem:[%s693_s6] ss:$0 sm:$0xff] }
  0xfa   :  { %v132_v34 = vmul.f32 0.70710677, %v124_v31  ;;  %v130_v41 = vmul.f32 0.5, %v124_v31 }
  0xfb   :  { %v131_v35 = vmul.f32 0.70710677, %v119_v33  ;;  %v129_v39 = vmul.f32 0.5, %v119_v33 }
  0xfc   :  { %474 = verf.f32 %v132_v34 }
  0xfd   :  { %476 = verf.f32 %v131_v35 }
 0x106   :  { %v475_v36 = vpop.eup %474 }
 0x107   :  { %v477_v37 = vpop.eup %476  ;;  %v136_v38 = vadd.f32 1.0, %v475_v36 }
 0x108   :  { %v135_v40 = vadd.f32 1.0, %v477_v37 }
 0x109   :  { %v617_v44 = vmul.f32 %v136_v38, %v130_v41 }
 0x10a   :  { %v612_v42 = vmul.f32 %v135_v40, %v129_v39 }
 0x10b   :  { %v146_v45 = vmul.f32 %v617_v44, %v617_v44 }
 0x10c   :  { %139 = vadd.xlane.f32.xlu0 %v612_v42  ;;  %v145_v43 = vmul.f32 %v612_v42, %v612_v42 }
 0x10e   :  { %147 = vadd.xlane.f32.xlu1 %v145_v43 }
 0x110   :  { %141 = vadd.xlane.f32.xlu0 %v617_v44 }
 0x112   :  { %149 = vadd.xlane.f32.xlu1 %v146_v45 }
 0x199   :  { %v140_v3 = vpop.xlane.xlu0 %139 }
 0x19a   :  { %v143_v4 = vmul.f32 0.015625, %v140_v3 }
 0x19b   :  { %v148_v5 = vpop.xlane.xlu1 %147 }
 0x19c   :  { %v153_v6 = vmul.f32 %v143_v4, %v143_v4  ;;  %v151_v7 = vmul.f32 0.015625, %v148_v5  ;;  %v157_v17 = vsub.f32 %v612_v42, %v143_v4 }
 0x19d   :  { %v142_v8 = vpop.xlane.xlu0 %141 }
 0x19e   :  { %v155_v9 = vsub.f32 %v151_v7, %v153_v6  ;;  %v144_v10 = vmul.f32 0.015625, %v142_v8 }
 0x19f   :  { %v150_v11 = vpop.xlane.xlu1 %149 }
 0x1a0   :  { %v159_v12 = vadd.f32 1e-05, %v155_v9  ;;  %v154_v13 = vmul.f32 %v144_v10, %v144_v10  ;;  %v152_v14 = vmul.f32 0.015625, %v150_v11  ;;  %v158_v22 = vsub.f32 %v617_v44, %v144_v10 }
 0x1a2   :  { %478 = vrsqrt.f32 %v159_v12  ;;  %v156_v15 = vsub.f32 %v152_v14, %v154_v13 }
 0x1a4   :  { %v160_v16 = vadd.f32 1e-05, %v156_v15 }
 0x1a6   :  { %480 = vrsqrt.f32 %v160_v16 }
 0x1ac   :  { %v479_v18 = vpop.eup %478 }
 0x1ad   :  { %v163_v20 = vmul.f32 %v479_v18, %v157_v17 }
 0x1af   :  { %v171_v23 = vmul.f32 %v298_v19, %v163_v20 }
 0x1b0   :  { %v481_v24 = vpop.eup %480 }
 0x1b1   :  { %v164_v25 = vmul.f32 %v481_v24, %v158_v22  ;;  %v179_v26 = vadd.f32 %v299_v21, %v171_v23 }
 0x1b3   :  { %v172_v27 = vmul.f32 %v298_v19, %v164_v25  ;;  %404 = vmatprep.mubr.f32.mxu1 %v179_v26 }
 0x1b5   :  { %v180_v28 = vadd.f32 %v299_v21, %v172_v27 }
 0x1b7   :  { %405 = vmatmul.mubr.f32.vlgmr.msra.gmra.mrb[0].mxu1 %v180_v28 }
 0x28a   :  { %v406_v30 = vpop.f32.mrb[0].mxu1 }
 0x28b   :  { %v276_v31 = vadd.f32 %v406_v30, %v300_v29  ;;  %v270_v32 = vpop.f32.mrb[1].mxu1 }
 0x28c   :  { %v271_v33 = vadd.f32 %v300_v29, %v270_v32 }
 0x28d   :  { %280 = vst [vmem:[#allocation2 + $0x8] sm:$0xff] %v276_v31 }
 0x28e   :  { %279 = vst [vmem:[#allocation2] sm:$0xff] %v271_v33 }
 0x28f   :  { %493 = shalt.err (!%p490_p4)
}
 0x290   :  { %s494_s6 = scalar_lea.hbm %s694_s7, 256 }
 0x291   :  { %p495_p5 = scmp.ne.s32.totalorder %s694_s7, %s494_s6  ;;  %p498_p6 = scmp.lt.u32.totalorder %s494_s6, %s694_s7 }
 0x293   :  { %p500_p7 = pnand %p498_p6, %p495_p5 }
 0x295   :  { %503 = shalt.err (!%p500_p7)
}
 0x296   :  { %s507_s8 = smov 128   ;;  %s508_s9 = smov 8  }
 0x297   :  { %292 = dma.vmem_to_hbm [thread:$0]  %s287_s24, 256, %s694_s7, [#allocation3], %s507_s8, %s507_s8, %s508_s9  }
 0x298   :  { %504 = dma.done.wait [#allocation3], 256  }
 0x299   :  { %505 = vsyncadd [#allocation3], 4294967040 }
 0x29a   :  { %296 = vsyncpa [#allocation3], 1 }

</bundles_post_ra>
